<compile_context>
chip_gen: v6e
topology: v6e:2x2x1
jax: 0.10.0
libtpu: 0.0.40
codegen_flags: <defaults>
</compile_context>

<pallas_src>
import functools

import jax
import jax.numpy as jnp
from jax.experimental import pallas as pl
from jax.experimental.pallas import tpu as pltpu


def _downsample_kernel(x_ref, w_ref, o_ref):
    # x_ref: (1, TH2, Wq, 8*Cin)  qy-baked space-to-depth rows, Wq = W2 + 1
    # w_ref: (2, 8*Cin, Npad)     per-qx-tap fused weights, N padded to 128
    # o_ref: (1, TH2, W2, Npad)   fused conv + PixelUnshuffle(2) tile (chan-padded)
    TH2, W2, Np = o_ref.shape[1], o_ref.shape[2], o_ref.shape[3]
    K = x_ref.shape[3]

    x = x_ref[0]                                    # (TH2, Wq, 8*Cin)
    # Two quad-column taps, flattened to 2-D so each is ONE large-M matmul.
    t0 = x[:, 0:W2, :].reshape(TH2 * W2, K)         # qx = 0
    t1 = x[:, 1:W2 + 1, :].reshape(TH2 * W2, K)     # qx = 1

    acc = jnp.dot(t0, w_ref[0], preferred_element_type=jnp.float32)
    acc = acc + jnp.dot(t1, w_ref[1], preferred_element_type=jnp.float32)
    o_ref[0] = acc.reshape(TH2, W2, Np).astype(o_ref.dtype)


def _vmem_capacity_bytes():
    try:
        return int(pltpu.get_tpu_info().vmem_capacity_bytes)
    except Exception:
        return 128 * 1024 * 1024


def _pick_row_tile(H2, B, per_row_bytes, budget_bytes):
    """Largest divisor of H2 that fits the VMEM budget AND keeps >=4 grid steps."""
    cap = max(1, budget_bytes // max(per_row_bytes, 1))
    min_tiles = -(-4 // max(B, 1))          # ceil(4/B): >=4 total grid steps
    divisors = [d for d in range(1, H2 + 1) if H2 % d == 0]
    fits = [d for d in divisors if d <= cap]
    good = [d for d in fits if H2 // d >= min_tiles]
    if good:
        return max(good)
    if fits:
        return max(fits)
    return 1


def _fuse_weights(weight_oihw, Cin, Cout, Npad, dtype):
    """Fused conv3x3+PixelUnshuffle(2) weights: (2[qx], 8*Cin, Npad).

    K index = qy*4*Cin + py*2*Cin + px*Cin + cin (matches the qy-baked input),
    N index = c*4 + i*2 + j (PixelUnshuffle channel order), zero-padded to Npad.
    Entry = w3[2*qy+py-i, 2*qx+px-j, cin, c], zero if the 3x3 index is out of range.
    """
    w3 = jnp.transpose(weight_oihw, (2, 3, 1, 0))          # (ky, kx, Cin, Cout)
    w_t = jnp.zeros((2, 2, 2, 2, Cin, Cout, 2, 2), w3.dtype)
    for qx in range(2):
        for qy in range(2):
            for py in range(2):
                for px in range(2):
                    for i in range(2):
                        for j in range(2):
                            ky = 2 * qy + py - i
                            kx = 2 * qx + px - j
                            if 0 <= ky < 3 and 0 <= kx < 3:
                                w_t = w_t.at[qx, qy, py, px, :, :, i, j].set(w3[ky, kx])
    w_f = w_t.reshape(2, 8 * Cin, 4 * Cout)
    w_f = jnp.pad(w_f, ((0, 0), (0, 0), (0, Npad - 4 * Cout)))
    return w_f.astype(dtype)


def downsample(x_nchw, weight_oihw, *, row_tile=None, compute_dtype=jnp.bfloat16):
    """Downsample.forward: conv3x3(n_feat -> n_feat//2, pad=1, no bias) + PixelUnshuffle(2).

    x_nchw: (B, Cin, H, W), weight_oihw: (Cin//2, Cin, 3, 3). Returns (B, 2*Cin, H/2, W/2).
    """
    B, Cin, H, W = x_nchw.shape
    Cout = weight_oihw.shape[0]
    assert H % 2 == 0 and W % 2 == 0, "PixelUnshuffle(2) needs even spatial dims"
    H2, W2 = H // 2, W // 2
    Hq, Wq = H2 + 1, W2 + 1
    cin4, cin8 = 4 * Cin, 8 * Cin
    cout4 = 4 * Cout
    Npad = -(-cout4 // 128) * 128                     # lane-dense / full-MXU N
    dtype = jnp.dtype(compute_dtype)
    itemsize = dtype.itemsize

    # ---------------- weight prep (layout glue, once) ----------------
    w_fused = _fuse_weights(weight_oihw, Cin, Cout, Npad, dtype)   # (2, 8Cin, Npad)

    # ---------------- input prep (layout glue) ----------------
    # NCHW -> NHWC, zero-pad by 1, space-to-depth(2) -> (B, Hq, Wq, 4*Cin),
    # then bake the qy (row-neighbour) quad into channels -> (B, H2, Wq, 8*Cin).
    # Row tiles of this tensor are NON-overlapping (no halo duplication pass).
    x = jnp.transpose(x_nchw, (0, 2, 3, 1)).astype(dtype)           # (B, H, W, Cin)
    xp = jnp.pad(x, ((0, 0), (1, 1), (1, 1), (0, 0)))               # (B, H+2, W+2, Cin)
    xq = xp.reshape(B, Hq, 2, Wq, 2, Cin)
    xq = jnp.transpose(xq, (0, 1, 3, 2, 4, 5)).reshape(B, Hq, Wq, cin4)
    xr = jnp.concatenate([xq[:, :H2], xq[:, 1:]], axis=-1)          # (B, H2, Wq, 8Cin)

    # ---------------- generation-aware tiling ----------------
    vmem_cap = _vmem_capacity_bytes()                 # 64 MiB on v7x, 128 MiB v5e/v6e
    budget = vmem_cap // 6                            # per-step working-set budget
    w_bytes = 2 * w_fused.size * itemsize             # weight (conservatively x2)
    per_row = (2 * Wq * cin8 * itemsize               # input block, double-buffered
               + 2 * W2 * Npad * itemsize             # output block, double-buffered
               + 2 * W2 * cin8 * itemsize             # in-kernel tap copies
               + 2 * W2 * Npad * 4)                   # f32 accumulator + store temp
    if row_tile is not None:
        TH2 = int(row_tile)
        assert H2 % TH2 == 0
    else:
        TH2 = _pick_row_tile(H2, B, per_row, max(budget - w_bytes, per_row))
    n_t = H2 // TH2

    flops = 2 * B * H2 * W2 * (2 * cin8) * Npad
    bytes_accessed = (xr.size + w_fused.size + B * H2 * W2 * Npad) * itemsize

    out_nhwc = pl.pallas_call(
        _downsample_kernel,
        out_shape=jax.ShapeDtypeStruct((B, H2, W2, Npad), dtype),
        grid_spec=pltpu.PrefetchScalarGridSpec(
            num_scalar_prefetch=0,
            grid=(B, n_t),
            in_specs=[
                pl.BlockSpec((1, TH2, Wq, cin8), lambda b, t: (b, t, 0, 0)),
                # Weight block index never changes; kept as a plain spec for
                # lowering robustness (its double-buffer cost is subtracted
                # from the row-tile budget above).
                pl.BlockSpec((2, cin8, Npad), lambda b, t: (0, 0, 0)),
            ],
            out_specs=pl.BlockSpec((1, TH2, W2, Npad), lambda b, t: (b, t, 0, 0)),
        ),
        compiler_params=pltpu.CompilerParams(
            dimension_semantics=("parallel", "parallel"),
            vmem_limit_bytes=int(min(vmem_cap // 2, 64 * 1024 * 1024))),
        cost_estimate=pl.CostEstimate(
            flops=flops, transcendentals=0, bytes_accessed=bytes_accessed),
    )(xr, w_fused)

    # Drop channel padding, back to PyTorch NCHW (channel index = c*4 + i*2 + j).
    out = out_nhwc[..., :cout4]
    return jnp.transpose(out, (0, 3, 1, 2)).astype(x_nchw.dtype)


if __name__ == "__main__":
    # Small, module-consistent shapes: batch=2, n_feat=4, spatial=16.
    B, n_feat, H, W = 2, 4, 16, 16
    key = jax.random.PRNGKey(0)
    kx, kw = jax.random.split(key)

    x = jax.random.normal(kx, (B, n_feat, H, W), dtype=jnp.float32)
    # Conv2d(n_feat, n_feat//2, 3, bias=False) weights, OIHW.
    w = jax.random.normal(kw, (n_feat // 2, n_feat, 3, 3), dtype=jnp.float32) * 0.1

    # Pure-JAX reference: conv3x3 (pad 1, no bias) then PixelUnshuffle(2).
    ref = jax.lax.conv_general_dilated(
        x, w, window_strides=(1, 1), padding=((1, 1), (1, 1)),
        dimension_numbers=("NCHW", "OIHW", "NCHW"))
    Bc, Cc, Hc, Wc = ref.shape
    ref = ref.reshape(Bc, Cc, Hc // 2, 2, Wc // 2, 2)
    ref = jnp.transpose(ref, (0, 1, 3, 5, 2, 4)).reshape(Bc, Cc * 4, Hc // 2, Wc // 2)

    # f32 compute path: tight-ish tolerance (catches any indexing / weight-fusion
    # bug, which would give O(1) errors).  Not 1e-5 because TPU default-precision
    # f32 matmul/conv may use bf16 MXU passes on both sides.
    out_f32 = jax.jit(functools.partial(downsample, compute_dtype=jnp.float32))(x, w)
    jax.block_until_ready(out_f32)
    assert out_f32.shape == (B, 2 * n_feat, H // 2, W // 2)
    err32 = float(jnp.max(jnp.abs(out_f32 - ref)))
    assert err32 < 1e-2, f"f32 path max abs err vs reference: {err32}"

    # Default bf16 compute path (HBM/MXU optimized), looser tolerance.
    out_bf16 = jax.jit(downsample)(x, w)
    jax.block_until_ready(out_bf16)
    assert out_bf16.shape == (B, 2 * n_feat, H // 2, W // 2)
    err16 = float(jnp.max(jnp.abs(out_bf16 - ref)))
    assert err16 < 6e-2, f"bf16 path max abs err vs reference: {err16}"

    print("KERNEL_OK")
</pallas_src>

<mosaic_0001>
module attributes {stable_mosaic.version = 11 : i64} {
  func.func @_downsample_kernel(%arg0: i32, %arg1: i32, %arg2: memref<1x4x9x32xf32, #tpu.memory_space<vmem>>, %arg3: memref<2x32x128xf32, #tpu.memory_space<vmem>>, %arg4: memref<1x4x8x128xf32, #tpu.memory_space<vmem>>) attributes {dimension_semantics = [#tpu.dimension_semantics<parallel>, #tpu.dimension_semantics<parallel>], iteration_bounds = array<i64: 2, 2>, scalar_prefetch = 0 : i64, scratch_operands = 0 : i64, tpu.core_type = #tpu.core_type<tc>, window_params = [{transform_indices = @transform_0, window_bounds = array<i64: 1, 4, 9, 32>}, {pipeline_mode = #tpu.pipeline_mode<synchronous>, transform_indices = @transform_1, window_bounds = array<i64: 2, 32, 128>}, {transform_indices = @transform_2, window_bounds = array<i64: 1, 4, 8, 128>}]} {
    %c0 = arith.constant 0 : index
    %c0_0 = arith.constant 0 : index
    %c0_1 = arith.constant 0 : index
    %c0_2 = arith.constant 0 : index
    %0 = vector.load %arg2[%c0, %c0_0, %c0_1, %c0_2] : memref<1x4x9x32xf32, #tpu.memory_space<vmem>>, vector<1x4x9x32xf32>
    %1 = vector.shape_cast %0 : vector<1x4x9x32xf32> to vector<4x9x32xf32>
    %2 = vector.extract_strided_slice %1 {offsets = [0, 0, 0], sizes = [4, 8, 32], strides = [1, 1, 1]} : vector<4x9x32xf32> to vector<4x8x32xf32>
    %3 = vector.shape_cast %2 : vector<4x8x32xf32> to vector<32x32xf32>
    %4 = vector.extract_strided_slice %1 {offsets = [0, 1, 0], sizes = [4, 8, 32], strides = [1, 1, 1]} : vector<4x9x32xf32> to vector<4x8x32xf32>
    %5 = vector.shape_cast %4 : vector<4x8x32xf32> to vector<32x32xf32>
    %c0_3 = arith.constant 0 : index
    %c0_4 = arith.constant 0 : index
    %c0_5 = arith.constant 0 : index
    %6 = vector.load %arg3[%c0_3, %c0_4, %c0_5] : memref<2x32x128xf32, #tpu.memory_space<vmem>>, vector<1x32x128xf32>
    %7 = vector.shape_cast %6 : vector<1x32x128xf32> to vector<32x128xf32>
    %cst = arith.constant dense<0.000000e+00> : vector<32x128xf32>
    %8 = tpu.matmul %3, %7, %cst {dimension_numbers = #tpu.dot_dimension_numbers<[1], [0], [0], [1], [0, 0, 1, 1], [], []>} : vector<32x32xf32>, vector<32x128xf32>, vector<32x128xf32> -> vector<32x128xf32>
    %c1 = arith.constant 1 : index
    %c0_6 = arith.constant 0 : index
    %c0_7 = arith.constant 0 : index
    %9 = vector.load %arg3[%c1, %c0_6, %c0_7] : memref<2x32x128xf32, #tpu.memory_space<vmem>>, vector<1x32x128xf32>
    %10 = vector.shape_cast %9 : vector<1x32x128xf32> to vector<32x128xf32>
    %cst_8 = arith.constant dense<0.000000e+00> : vector<32x128xf32>
    %11 = tpu.matmul %5, %10, %cst_8 {dimension_numbers = #tpu.dot_dimension_numbers<[1], [0], [0], [1], [0, 0, 1, 1], [], []>} : vector<32x32xf32>, vector<32x128xf32>, vector<32x128xf32> -> vector<32x128xf32>
    %12 = arith.addf %8, %11 : vector<32x128xf32>
    %13 = vector.shape_cast %12 : vector<32x128xf32> to vector<4x8x128xf32>
    %c0_9 = arith.constant 0 : index
    %c0_10 = arith.constant 0 : index
    %c0_11 = arith.constant 0 : index
    %c0_12 = arith.constant 0 : index
    %14 = vector.load %arg4[%c0_9, %c0_10, %c0_11, %c0_12] : memref<1x4x8x128xf32, #tpu.memory_space<vmem>>, vector<1x4x8x128xf32>
    %15 = vector.shape_cast %14 : vector<1x4x8x128xf32> to vector<4x8x128xf32>
    %16 = vector.shape_cast %13 : vector<4x8x128xf32> to vector<1x4x8x128xf32>
    tpu.vector_store %arg4[%c0_9, %c0_10, %c0_11, %c0_12], %16 {strides = array<i32>} : memref<1x4x8x128xf32, #tpu.memory_space<vmem>>, vector<1x4x8x128xf32>,
    return
  }
  func.func @transform_0(%arg0: i32, %arg1: i32) -> (i32, i32, i32, i32) {
    %c0_i32 = arith.constant 0 : i32
    %c0_i32_0 = arith.constant 0 : i32
    %c0_i32_1 = arith.constant 0 : i32
    return %arg0, %arg1, %c0_i32, %c0_i32_0 : i32, i32, i32, i32
  }
  func.func @transform_1(%arg0: i32, %arg1: i32) -> (i32, i32, i32) {
    %c0_i32 = arith.constant 0 : i32
    %c0_i32_0 = arith.constant 0 : i32
    %c0_i32_1 = arith.constant 0 : i32
    %c0_i32_2 = arith.constant 0 : i32
    return %c0_i32, %c0_i32_0, %c0_i32_1 : i32, i32, i32
  }
  func.func @transform_2(%arg0: i32, %arg1: i32) -> (i32, i32, i32, i32) {
    %c0_i32 = arith.constant 0 : i32
    %c0_i32_0 = arith.constant 0 : i32
    %c0_i32_1 = arith.constant 0 : i32
    return %arg0, %arg1, %c0_i32, %c0_i32_0 : i32, i32, i32, i32
  }
}

</mosaic_0001>

<bundles_post_ra>
// kernel: downsample.1
= control target key start
LH: loop header
LB: loop body
LE: loop exit
PB: predicated region body
PF: predicated region fallthrough
CT: control target
= control target key end

     0   :  { %s673_s9 = smov 0   ;;  %s675_s10 = smov 0   ;;  %s771_s0 = inlined_call_operand.vmem [shape: f32[2,8,9,32], index: 0, kind: input, shape index: {}]   ;;  %s772_s1 = inlined_call_operand.vmem [shape: f32[2,32,128], index: 1, kind: input, shape index: {}]   ;;  %s773_s2 = inlined_call_operand.vmem [shape: f32[2,8,8,128], index: 2, kind: output, shape index: {}]  }
   0x1   :  { %s677_s11 = smov 0   ;;  %s679_s12 = smov 0  }
   0x2   :  { %s681_s13 = smov 0  }
   0x3 LB: > { %s21_s14 = sadd.s32 1, %s648_s11  ;;  %s24_s15 = sadd.s32 1, %s652_s12  ;;  %s656_s13 = sphi %s681_s13, %s12_s13   ;;  %s652_s12 = sphi %s679_s12, %s777_s12   ;;  %s648_s11 = sphi %s677_s11, %s776_s11   ;;  %s644_s10 = sphi %s675_s10, %s775_s10   ;;  %s640_s9 = sphi %s673_s9, %s774_s9  }
   0x4   : > { %p22_p0 = scmp.ge.s32.totalorder %s21_s14, 2  ;;  %p512_p1 = scmp.ge.s32.totalorder %s656_s13, 1 }
   0x5   : > { %p134_p2 = scmp.lt.s32.totalorder %s656_s13, 5 }
   0x6   : > { %s779_s14 = smov (%p22_p0, %s21_s14), 0  ;;  %s781_s15 = smov (!%p22_p0, %s24_s15), %s652_s12 }
   0x7   : > { %p135_p3 = pnand %p512_p1, %p134_p2  ;;  %p26_p4 = scmp.ge.s32.totalorder %s781_s15, 2 }
   0x8   : > { %s513_s22 = sshll.u32 (!%p135_p3), %s640_s9, 2  ;;  %p166_p5 = scmp.lt.s32.totalorder (!%p135_p3), %s644_s10, 1 }
   0x9   : > { %s783_s15 = smov (%p26_p4, %s781_s15), 0  ;;  %138 = sbr.rel (%p135_p3) target bundleno = 227 (0xe3), region = 28 }
   0xa   : > { %p168_p6 = scmp.lt.s32.totalorder (!%p135_p3), %s513_s22, 7 }
   0xe   : > { %v218_v0 = vld [vmem:[%s772_s1 + $0x18] sm:$0xff]  ;;  %v217_v2 = vld [vmem:[%s772_s1 + $0x10] sm:$0xff]  ;;  %v216_v4 = vld [vmem:[%s772_s1 + $0x8] sm:$0xff]  ;;  %s785_s10 = smov (!%p166_p5, %s644_s10), 1  ;;  %s787_s22 = smov (!%p168_p6, %s513_s22), 7  ;;  %vm224_vm0 = vcmask 261120  }
   0xf   : > { %v523_v1 = vld [vmem:[%s772_s1 + $0x38] sm:$0xff]  ;;  %564 = vmatprep.subr.mxu1 %v218_v0  ;;  %v522_v3 = vld [vmem:[%s772_s1 + $0x30] sm:$0xff]  ;;  %v521_v5 = vld [vmem:[%s772_s1 + $0x28] sm:$0xff]  ;;  %s515_s3 = sshll.u32 %s785_s10, 4  ;;  %s514_s6 = sshll.u32 %s787_s22, 1  ;;  %vm202_vm1 = vcmask 1046528  }
  0x10   : > { %550 = vmatprep.subr.mxu0 %v523_v1  ;;  %565 = vmatpush3.msra.mxu1 %v218_v0  ;;  %v215_v6 = vld [vmem:[%s772_s1] sm:$0xff]  ;;  %s172_s7 = sadd.s32 %s515_s3, %s514_s6  ;;  %s518_s18 = sshll.u32 %s785_s10, 3 }
  0x11   : > { %551 = vmatpush3.msra.mxu0 %v523_v1  ;;  %566 = vmatprep.subr.mxu1 %v217_v2  ;;  %v520_v7 = vld [vmem:[%s772_s1 + $0x20] sm:$0xff]  ;;  %s516_s8 = sshll.u32 %s172_s7, 3  ;;  %s182_s19 = sadd.s32 %s518_s18, %s787_s22 }
  0x12   : > { %552 = vmatprep.subr.mxu0 %v522_v3  ;;  %567 = vmatpush3.msra.mxu1 %v217_v2  ;;  %s174_s17 = scalar_lea.vmem %s771_s0, %s516_s8  ;;  %s519_s20 = sshll.u32 %s182_s19, 3 }
  0x13   : > { %553 = vmatpush3.msra.mxu0 %v522_v3  ;;  %568 = vmatprep.subr.mxu1 %v216_v4  ;;  %v186_v8 = vld [vmem:[%s174_s17] sm:$0xff]  ;;  %v188_v9 = vld [vmem:[%s174_s17 + $0x10] sm:$0xff]  ;;  %v187_v10 = vld [vmem:[%s174_s17 + $0x8] sm:$0x1]  ;;  %s184_s24 = scalar_lea.vmem %s773_s2, %s519_s20 }
  0x14   : > { %554 = vmatprep.subr.mxu0 %v521_v5  ;;  %569 = vmatpush3.msra.mxu1 %v216_v4  ;;  %v203_v11 = vrot.slane %v186_v8, 1  ;;  %v206_v12 = vrot.slane %v188_v9, 1  ;;  %v204_v13 = vrot.slane %v187_v10, 1  ;;  %v189_v14 = vld [vmem:[%s174_s17 + $0x18] sm:$0x1]  ;;  %v190_v15 = vld [vmem:[%s174_s17 + $0x20] sm:$0xff] }
  0x15   : > { %555 = vmatpush3.msra.mxu0 %v521_v5  ;;  %570 = vmatprep.subr.mxu1 %v215_v6  ;;  %v207_v16 = vrot.slane %v189_v14, 1  ;;  %v209_v17 = vrot.slane %v190_v15, 1  ;;  %v192_v18 = vld [vmem:[%s174_s17 + $0x30] sm:$0xff]  ;;  %v191_v19 = vld [vmem:[%s174_s17 + $0x28] sm:$0x1] }
  0x16   : > { %556 = vmatprep.subr.mxu0 %v520_v7  ;;  %571 = vmatpush3.msra.mxu1 %v215_v6  ;;  %v205_v20 = vsel %vm202_vm1, %v203_v11, %v204_v13  ;;  %v212_v21 = vrot.slane %v192_v18, 1  ;;  %v210_v22 = vrot.slane %v191_v19, 1  ;;  %v193_v23 = vld [vmem:[%s174_s17 + $0x38] sm:$0x1] }
  0x17   : > { %557 = vmatpush3.msra.mxu0 %v520_v7  ;;  %572 = vmatprep.mubr.msk.f32.mxu1 %vm224_vm0, %v186_v8  ;;  %v208_v24 = vsel %vm202_vm1, %v206_v12, %v207_v16  ;;  %v213_v25 = vrot.slane %v193_v23, 1 }
  0x18   : > { %573 = vmatmul.mubr.msk.f32.vlgmr.msra.gmra.mxu1 %vm224_vm0, %v188_v9  ;;  %558 = vmatprep.mubr.msk.f32.mxu0 %vm224_vm0, %v205_v20  ;;  %v211_v26 = vsel %vm202_vm1, %v209_v17, %v210_v22 }
  0x19   : > { %575 = vmatprep.mubr.msk.f32.mxu1 %vm224_vm0, %v190_v15  ;;  %559 = vmatmul.mubr.msk.f32.vlgmr.msra.gmra.mxu0 %vm224_vm0, %v208_v24  ;;  %v214_v27 = vsel %vm202_vm1, %v212_v21, %v213_v25 }
  0x1a   : > { %561 = vmatprep.mubr.msk.f32.mxu0 %vm224_vm0, %v211_v26 }
  0x1c   : > { %576 = vmatmul.mubr.msk.f32.gmra.mxu1 %vm224_vm0, %v192_v18 }
  0x1d   : > { %562 = vmatmul.mubr.msk.f32.gmra.mxu0 %vm224_vm0, %v214_v27 }
  0xd8   : > { %v574_v28 = vpop.f32.mrf.mxu1 }
  0xd9   : > { %v560_v30 = vpop.f32.mrf.mxu0 }
  0xda   : > { %v392_v29 = vpop.f32.mrf.mxu1  ;;  %v398_v31 = vadd.f32 %v574_v28, %v560_v30 }
  0xdb   : > { %v299_v32 = vpop.f32.mrf.mxu0 }
  0xdc   : > { %v577_v33 = vpop.f32.mrf.mxu1  ;;  %412 = vst [vmem:[%s184_s24 + $0x8] sm:$0xff] %v398_v31  ;;  %v393_v34 = vadd.f32 %v392_v29, %v299_v32 }
  0xdd   : > { %v563_v35 = vpop.f32.mrf.mxu0 }
  0xde   : > { %411 = vst [vmem:[%s184_s24] sm:$0xff] %v393_v34  ;;  %v408_v36 = vadd.f32 %v577_v33, %v563_v35  ;;  %v402_v37 = vpop.f32.mrf.mxu1 }
  0xdf   : > { %v309_v38 = vpop.f32.mrf.mxu0 }
  0xe0   : > { %414 = vst [vmem:[%s184_s24 + $0x18] sm:$0xff] %v408_v36  ;;  %v403_v39 = vadd.f32 %v402_v37, %v309_v38 }
  0xe2   : > { %413 = vst [vmem:[%s184_s24 + $0x10] sm:$0xff] %v403_v39 }
  0xe3 PF: > { %s12_s13 = sadd.s32 1, %s656_s13   ;;  %s774_s9 = smov %s648_s11 }
  0xe4   : > { %p9_p7 = scmp.ge.s32.totalorder %s12_s13, 6   ;;  %s775_s10 = smov %s652_s12 }
  0xe5   : > { %s776_s11 = smov %s779_s14  ;;  %s777_s12 = smov %s783_s15 }
  0xe6   :  { %11 = sbr.rel (!%p9_p7) target bundleno = 3 (0x3), region = 59 }

</bundles_post_ra>
